<compile_context>
chip_gen: v6e
topology: v6e:2x2x1
jax: 0.10.0
libtpu: 0.0.40
codegen_flags: <defaults>
</compile_context>

<pallas_src>
import math

import jax
import jax.numpy as jnp
from jax import lax
from jax.experimental import pallas as pl
from jax.experimental.pallas import tpu as pltpu


def cross_attention_kernel(
    claim_ref,    # (TB, nhid)     bf16  claim features (streamed over grid)
    cbatch_ref,   # (TB, 1)        i32   graph id per claim (-1 = padding)
    evid_ref,     # (Ne, nhid)     bf16  evidence features (resident, values)
    evidt_ref,    # (nhid, Ne)     bf16  evidence transposed (projection only)
    ebatch_ref,   # (1, Ne)        i32   graph id per evidence
    wc_ref,       # (nhid, 64)     bf16  project_c weight
    bc_ref,       # (1, 64)        f32   project_c bias
    wet_ref,      # (64, nhid)     bf16  project_e weight, pre-transposed
    bet_ref,      # (64, 1)        f32   project_e bias (column)
    wf_ref,       # (4*nhid, nhid) bf16  f_align weight
    bf_ref,       # (1, nhid)      f32   f_align bias
    out_ref,      # (G, nhid)      f32   per-core pooled-sum accumulator
    wet_scratch,  # (64, Ne)       bf16  persistent transposed evidence proj
):
    i = pl.program_id(1)   # claim-block axis within this core ("arbitrary")

    @pl.when(i == 0)
    def _init():
        # project_e computed once per core, stored already transposed so the
        # per-block logits matmul is a plain lane-dense (TB,64)@(64,Ne).
        wet = jnp.dot(wet_ref[...], evidt_ref[...],
                      preferred_element_type=jnp.float32) + bet_ref[...]
        wet_scratch[...] = wet.astype(jnp.bfloat16)
        out_ref[...] = jnp.zeros_like(out_ref)

    c16 = claim_ref[...]                          # (TB, nhid) bf16
    c = c16.astype(jnp.float32)                   # f32 for elementwise math
    cb = cbatch_ref[...]                          # (TB, 1) i32
    eb = ebatch_ref[...]                          # (1, Ne) i32

    # project_c -> (TB, 64), bf16 MXU operands, f32 accumulate
    wc = jnp.dot(c16, wc_ref[...],
                 preferred_element_type=jnp.float32) + bc_ref[...]

    # attention logits (TB, 64) @ (64, Ne)
    logits = jnp.dot(wc.astype(jnp.bfloat16), wet_scratch[...],
                     preferred_element_type=jnp.float32)      # (TB, Ne) f32

    # cross-graph mask; -1e30 keeps padded / evidence-less rows finite while
    # exp still underflows to exactly 0 for masked entries of live rows.
    same = cb == eb                                            # (TB, Ne) bool
    logits = jnp.where(same, logits, jnp.float32(-1e30))

    # softmax with deferred normalisation (f32 reductions -> v5e-safe).
    m = jnp.max(logits, axis=-1, keepdims=True)
    p = jnp.exp(logits - m)                                    # (TB, Ne) f32
    rowsum = jnp.sum(p, axis=-1, keepdims=True)                # (TB, 1)

    claim_new = jnp.dot(p.astype(jnp.bfloat16), evid_ref[...],
                        preferred_element_type=jnp.float32)    # (TB, nhid)
    claim_new = claim_new * pl.reciprocal(rowsum, approx=True)

    # rows with no same-graph evidence (incl. zero padding) contribute zero.
    n_same = jnp.sum(same.astype(jnp.float32), axis=-1, keepdims=True)
    has_ev = (n_same > 0.0).astype(jnp.float32)                # (TB, 1)
    claim_new = claim_new * has_ev

    # f_align on a lane-dense (TB, 4*nhid) tile -> one fat MXU GEMM.
    # TODO(synk): if nhid != 32 (4*nhid != 128), pre-fold the f_align weight
    # in the wrapper instead of concatenating sub-128-lane tiles here.
    a = jnp.concatenate([c, claim_new, c - claim_new, c * claim_new], axis=-1)
    a = jnp.dot(a.astype(jnp.bfloat16), wf_ref[...],
                preferred_element_type=jnp.float32) + bf_ref[...]   # (TB, nhid)

    # fused global (sum) pool: one-hot(claim -> graph) contraction over claims.
    tb = a.shape[0]
    g = out_ref.shape[0]
    graph_ids = lax.broadcasted_iota(jnp.int32, (tb, g), 1)    # (TB, G)
    onehot = (cb == graph_ids).astype(jnp.float32)             # (TB, G)
    pooled = lax.dot_general(onehot, a, (((0,), (0,)), ((), ())),
                             preferred_element_type=jnp.float32)  # (G, nhid)
    out_ref[...] += pooled


def cross_attention_forward(x, batch, claim_index, evidence_index, params,
                            num_graphs, block_claims=512, core_split=2):
    """Fused CrossAttention forward. Returns (num_graphs, nhid) pooled output."""
    nhid = x.shape[1]
    f32, bf16 = jnp.float32, jnp.bfloat16

    # TODO(synk): data-dependent row gathers (x[claim_index] etc.) stay in
    # plain JAX; an in-kernel version would need a manual DMA gather.
    claim = x[claim_index]
    evidence = x[evidence_index]
    claim_batch = batch[claim_index].astype(jnp.int32)
    evidence_batch = batch[evidence_index].astype(jnp.int32)

    nc = claim.shape[0]
    ne = evidence.shape[0]
    g = int(num_graphs)
    cores = max(1, int(core_split))

    # bf16 claim tiles: keep the sublane (row) block a multiple of 16.
    tb = int(min(block_claims, max(16, -(-nc // 16) * 16)))
    tb = -(-tb // 16) * 16
    bpc = pl.cdiv(pl.cdiv(nc, tb), cores)        # claim blocks per core
    nc_pad = cores * bpc * tb

    claim_p = jnp.pad(claim, ((0, nc_pad - nc), (0, 0))).astype(bf16)
    cbatch_p = jnp.pad(claim_batch, (0, nc_pad - nc),
                       constant_values=-1).reshape(nc_pad, 1)
    evid16 = evidence.astype(bf16)                # (Ne, nhid) attention values
    evid16_t = evid16.T                           # (nhid, Ne) one-time transpose
    ebatch = evidence_batch.reshape(1, ne)

    wc16 = params["wc"].astype(bf16)              # (nhid, 64)
    bc = params["bc"].astype(f32)                 # (1, 64)
    wet16 = params["we"].T.astype(bf16)           # (64, nhid) pre-transposed
    bet = params["be"].reshape(64, 1).astype(f32)
    wf16 = params["wf"].astype(bf16)              # (4*nhid, nhid)
    bfb = params["bf"].astype(f32)                # (1, nhid)

    # Explicit VMEM budget: double-buffered inputs + residents + temporaries.
    tile_bytes = (
        2 * (tb * nhid * 2 + tb * 4)                       # streamed claim tiles
        + 2 * (2 * ne * nhid * 2 + ne * 4)                 # evidence (+T) + ids
        + 2 * (nhid * 64 * 2 + 64 * 4 + 64 * nhid * 2 + 64 * 4
               + 4 * nhid * nhid * 2 + nhid * 4)           # weights / biases
        + 2 * g * nhid * 4                                 # pooled accumulator
        + 64 * ne * 2                                      # projection scratch
        + 4 * tb * ne * 4 + 2 * tb * 4 * nhid * 4          # softmax/concat temps
    )
    vmem_limit = int(min(96 * 2**20, max(32 * 2**20, 2 * tile_bytes + 16 * 2**20)))

    flops = 2.0 * (nc_pad * nhid * 64 + cores * ne * nhid * 64
                   + nc_pad * 64 * ne + nc_pad * ne * nhid
                   + nc_pad * 4 * nhid * nhid + nc_pad * g * nhid)
    bytes_accessed = (2 * (claim_p.size + evid16.size + evid16_t.size
                           + wc16.size + wet16.size + wf16.size)
                      + 4 * (cbatch_p.size + ebatch.size + bc.size + bet.size
                             + bfb.size + cores * g * nhid))

    grid_spec = pltpu.PrefetchScalarGridSpec(
        num_scalar_prefetch=0,
        grid=(cores, bpc),                                 # (parallel, arbitrary)
        in_specs=[
            pl.BlockSpec((tb, nhid), lambda c, i: (c * bpc + i, 0)),   # claims
            pl.BlockSpec((tb, 1), lambda c, i: (c * bpc + i, 0)),      # claim ids
            pl.BlockSpec((ne, nhid), lambda c, i: (0, 0)),             # evidence
            pl.BlockSpec((nhid, ne), lambda c, i: (0, 0)),             # evidence^T
            pl.BlockSpec((1, ne), lambda c, i: (0, 0)),                # evidence ids
            pl.BlockSpec((nhid, 64), lambda c, i: (0, 0)),             # Wc
            pl.BlockSpec((1, 64), lambda c, i: (0, 0)),                # bc
            pl.BlockSpec((64, nhid), lambda c, i: (0, 0)),             # We^T
            pl.BlockSpec((64, 1), lambda c, i: (0, 0)),                # be
            pl.BlockSpec((4 * nhid, nhid), lambda c, i: (0, 0)),       # Wf
            pl.BlockSpec((1, nhid), lambda c, i: (0, 0)),              # bf
        ],
        out_specs=pl.BlockSpec((None, g, nhid), lambda c, i: (c, 0, 0)),
        scratch_shapes=[pltpu.VMEM((64, ne), jnp.bfloat16)],
    )

    partial = pl.pallas_call(
        cross_attention_kernel,
        out_shape=jax.ShapeDtypeStruct((cores, g, nhid), jnp.float32),
        grid_spec=grid_spec,
        compiler_params=pltpu.CompilerParams(
            dimension_semantics=("parallel", "arbitrary"),
            vmem_limit_bytes=vmem_limit),
        cost_estimate=pl.CostEstimate(
            flops=int(flops),
            transcendentals=int(nc_pad * ne),
            bytes_accessed=int(bytes_accessed)),
    )(claim_p, cbatch_p, evid16, evid16_t, ebatch,
      wc16, bc, wet16, bet, wf16, bfb)

    # mean-pool finalize: sum per-core partials and scale by 1/claims-per-graph
    counts = jnp.sum(jax.nn.one_hot(claim_batch, g, dtype=f32), axis=0)
    inv_counts = (1.0 / jnp.maximum(counts, 1.0)).reshape(g, 1)
    return jnp.sum(partial, axis=0) * inv_counts


def init_params(key, nhid):
    """PyTorch-Linear-style init; weights stored (in, out) so kernel does x@W+b."""
    ks = jax.random.split(key, 6)

    def lin(kw, kb, fan_in, fan_out):
        s = 1.0 / math.sqrt(fan_in)
        w = jax.random.uniform(kw, (fan_in, fan_out), jnp.float32, -s, s)
        b = jax.random.uniform(kb, (1, fan_out), jnp.float32, -s, s)
        return w, b

    wc, bc = lin(ks[0], ks[1], nhid, 64)
    we, be = lin(ks[2], ks[3], nhid, 64)
    wf, bf = lin(ks[4], ks[5], 4 * nhid, nhid)
    return {"wc": wc, "bc": bc, "we": we, "be": be, "wf": wf, "bf": bf}


def ref_forward(x, batch, claim_index, evidence_index, p, num_graphs):
    """Plain-JAX f32 reference mirroring the PyTorch module."""
    claim = x[claim_index]
    evidence = x[evidence_index]
    cb = batch[claim_index]
    eb = batch[evidence_index]
    wc = claim @ p["wc"] + p["bc"]
    we = evidence @ p["we"] + p["be"]
    logits = wc @ we.T
    mask = jnp.where(cb[:, None] == eb[None, :], 0.0, -jnp.inf)
    attn = jax.nn.softmax(logits + mask, axis=-1)
    claim_new = attn @ evidence
    a = jnp.concatenate(
        [claim, claim_new, claim - claim_new, claim * claim_new], axis=-1)
    a = a @ p["wf"] + p["bf"]
    onehot = jax.nn.one_hot(cb, num_graphs, dtype=jnp.float32)   # (Nc, G)
    summed = onehot.T @ a
    counts = jnp.maximum(jnp.sum(onehot, axis=0), 1.0)[:, None]
    return summed / counts


if __name__ == "__main__":
    key = jax.random.PRNGKey(0)
    nhid = 32
    num_graphs = 4
    nodes_per_graph = 24
    n_nodes = num_graphs * nodes_per_graph

    kx, kp = jax.random.split(key, 2)
    x = jax.random.normal(kx, (n_nodes, nhid), jnp.float32)
    batch = jnp.repeat(jnp.arange(num_graphs, dtype=jnp.int32), nodes_per_graph)

    # per graph: first 10 nodes are claims, remaining 14 are evidences
    claim_index = jnp.concatenate(
        [gi * nodes_per_graph + jnp.arange(10, dtype=jnp.int32)
         for gi in range(num_graphs)])        # 40 claims
    evidence_index = jnp.concatenate(
        [gi * nodes_per_graph + 10 + jnp.arange(14, dtype=jnp.int32)
         for gi in range(num_graphs)])        # 56 evidences

    params = init_params(kp, nhid)

    res = cross_attention_forward(
        x, batch, claim_index, evidence_index, params,
        num_graphs=num_graphs, block_claims=16, core_split=2)  # grid (2, 2)
    jax.block_until_ready(res)

    ref = ref_forward(x, batch, claim_index, evidence_index, params, num_graphs)
    assert res.shape == (num_graphs, nhid)
    max_err = float(jnp.max(jnp.abs(res - ref)))
    # bf16 MXU operands + approx reciprocal -> relaxed tolerance vs f32 ref
    assert jnp.allclose(res, ref, atol=6e-2, rtol=6e-2), max_err

    print("KERNEL_OK")
</pallas_src>

<mosaic_0001>
module attributes {stable_mosaic.version = 11 : i64} {
  func.func @cross_attention_kernel(%arg0: i32, %arg1: i32, %arg2: memref<16x32xbf16, #tpu.memory_space<vmem>>, %arg3: memref<16x1xi32, #tpu.memory_space<vmem>>, %arg4: memref<56x32xbf16, #tpu.memory_space<vmem>>, %arg5: memref<32x56xbf16, #tpu.memory_space<vmem>>, %arg6: memref<1x56xi32, #tpu.memory_space<vmem>>, %arg7: memref<32x64xbf16, #tpu.memory_space<vmem>>, %arg8: memref<1x64xf32, #tpu.memory_space<vmem>>, %arg9: memref<64x32xbf16, #tpu.memory_space<vmem>>, %arg10: memref<64x1xf32, #tpu.memory_space<vmem>>, %arg11: memref<128x32xbf16, #tpu.memory_space<vmem>>, %arg12: memref<1x32xf32, #tpu.memory_space<vmem>>, %arg13: memref<1x4x32xf32, #tpu.memory_space<vmem>>, %arg14: memref<64x56xbf16, #tpu.memory_space<vmem>>) attributes {dimension_semantics = [#tpu.dimension_semantics<parallel>, #tpu.dimension_semantics<arbitrary>], iteration_bounds = array<i64: 2, 2>, scalar_prefetch = 0 : i64, scratch_operands = 1 : i64, tpu.core_type = #tpu.core_type<tc>, window_params = [{transform_indices = @transform_0, window_bounds = array<i64: 16, 32>}, {transform_indices = @transform_1, window_bounds = array<i64: 16, 1>}, {pipeline_mode = #tpu.pipeline_mode<synchronous>, transform_indices = @transform_2, window_bounds = array<i64: 56, 32>}, {pipeline_mode = #tpu.pipeline_mode<synchronous>, transform_indices = @transform_3, window_bounds = array<i64: 32, 56>}, {pipeline_mode = #tpu.pipeline_mode<synchronous>, transform_indices = @transform_4, window_bounds = array<i64: 1, 56>}, {pipeline_mode = #tpu.pipeline_mode<synchronous>, transform_indices = @transform_5, window_bounds = array<i64: 32, 64>}, {pipeline_mode = #tpu.pipeline_mode<synchronous>, transform_indices = @transform_6, window_bounds = array<i64: 1, 64>}, {pipeline_mode = #tpu.pipeline_mode<synchronous>, transform_indices = @transform_7, window_bounds = array<i64: 64, 32>}, {pipeline_mode = #tpu.pipeline_mode<synchronous>, transform_indices = @transform_8, window_bounds = array<i64: 64, 1>}, {pipeline_mode = #tpu.pipeline_mode<synchronous>, transform_indices = @transform_9, window_bounds = array<i64: 128, 32>}, {pipeline_mode = #tpu.pipeline_mode<synchronous>, transform_indices = @transform_10, window_bounds = array<i64: 1, 32>}, {transform_indices = @transform_11, window_bounds = array<i64: 1, 4, 32>}]} {
    %c0_i32 = arith.constant 0 : i32
    %0 = arith.cmpi eq, %arg1, %c0_i32 : i32
    %1 = arith.extui %0 : i1 to i32
    %c0_i32_0 = arith.constant 0 : i32
    %2 = arith.cmpi ne, %1, %c0_i32_0 : i32
    scf.if %2 {
      %c0_33 = arith.constant 0 : index
      %c0_34 = arith.constant 0 : index
      %64 = vector.load %arg9[%c0_33, %c0_34] : memref<64x32xbf16, #tpu.memory_space<vmem>>, vector<64x32xbf16>
      %c0_35 = arith.constant 0 : index
      %c0_36 = arith.constant 0 : index
      %65 = vector.load %arg5[%c0_35, %c0_36] : memref<32x56xbf16, #tpu.memory_space<vmem>>, vector<32x56xbf16>
      %cst_37 = arith.constant dense<0.000000e+00> : vector<64x56xf32>
      %66 = tpu.matmul %64, %65, %cst_37 {dimension_numbers = #tpu.dot_dimension_numbers<[1], [0], [0], [1], [0, 0, 1, 1], [], []>} : vector<64x32xbf16>, vector<32x56xbf16>, vector<64x56xf32> -> vector<64x56xf32>
      %c0_38 = arith.constant 0 : index
      %c0_39 = arith.constant 0 : index
      %67 = vector.load %arg10[%c0_38, %c0_39] : memref<64x1xf32, #tpu.memory_space<vmem>>, vector<64x1xf32>
      %68 = vector.broadcast %67 : vector<64x1xf32> to vector<64x56xf32>
      %69 = arith.addf %66, %68 : vector<64x56xf32>
      %70 = arith.truncf %69 : vector<64x56xf32> to vector<64x56xbf16>
      %c0_40 = arith.constant 0 : index
      %c0_41 = arith.constant 0 : index
      %71 = vector.load %arg14[%c0_40, %c0_41] : memref<64x56xbf16, #tpu.memory_space<vmem>>, vector<64x56xbf16>
      tpu.vector_store %arg14[%c0_40, %c0_41], %70 {strides = array<i32>} : memref<64x56xbf16, #tpu.memory_space<vmem>>, vector<64x56xbf16>,
      %cst_42 = arith.constant 0.000000e+00 : f32
      %72 = vector.broadcast %cst_42 : f32 to vector<4x32xf32>
      %c0_43 = arith.constant 0 : index
      %c0_44 = arith.constant 0 : index
      %c0_45 = arith.constant 0 : index
      %73 = vector.load %arg13[%c0_43, %c0_44, %c0_45] : memref<1x4x32xf32, #tpu.memory_space<vmem>>, vector<1x4x32xf32>
      %74 = vector.shape_cast %73 : vector<1x4x32xf32> to vector<4x32xf32>
      %75 = vector.shape_cast %72 : vector<4x32xf32> to vector<1x4x32xf32>
      tpu.vector_store %arg13[%c0_43, %c0_44, %c0_45], %75 {strides = array<i32>} : memref<1x4x32xf32, #tpu.memory_space<vmem>>, vector<1x4x32xf32>,
    } else {
    }
    %c0 = arith.constant 0 : index
    %c0_1 = arith.constant 0 : index
    %3 = vector.load %arg2[%c0, %c0_1] : memref<16x32xbf16, #tpu.memory_space<vmem>>, vector<16x32xbf16>
    %4 = arith.extf %3 : vector<16x32xbf16> to vector<16x32xf32>
    %c0_2 = arith.constant 0 : index
    %c0_3 = arith.constant 0 : index
    %5 = vector.load %arg3[%c0_2, %c0_3] : memref<16x1xi32, #tpu.memory_space<vmem>>, vector<16x1xi32>
    %c0_4 = arith.constant 0 : index
    %c0_5 = arith.constant 0 : index
    %6 = vector.load %arg6[%c0_4, %c0_5] : memref<1x56xi32, #tpu.memory_space<vmem>>, vector<1x56xi32>
    %c0_6 = arith.constant 0 : index
    %c0_7 = arith.constant 0 : index
    %7 = vector.load %arg7[%c0_6, %c0_7] : memref<32x64xbf16, #tpu.memory_space<vmem>>, vector<32x64xbf16>
    %cst = arith.constant dense<0.000000e+00> : vector<16x64xf32>
    %8 = tpu.matmul %3, %7, %cst {dimension_numbers = #tpu.dot_dimension_numbers<[1], [0], [0], [1], [0, 0, 1, 1], [], []>} : vector<16x32xbf16>, vector<32x64xbf16>, vector<16x64xf32> -> vector<16x64xf32>
    %c0_8 = arith.constant 0 : index
    %c0_9 = arith.constant 0 : index
    %9 = vector.load %arg8[%c0_8, %c0_9] : memref<1x64xf32, #tpu.memory_space<vmem>>, vector<1x64xf32>
    %10 = vector.broadcast %9 : vector<1x64xf32> to vector<16x64xf32>
    %11 = arith.addf %8, %10 : vector<16x64xf32>
    %12 = arith.truncf %11 : vector<16x64xf32> to vector<16x64xbf16>
    %c0_10 = arith.constant 0 : index
    %c0_11 = arith.constant 0 : index
    %13 = vector.load %arg14[%c0_10, %c0_11] : memref<64x56xbf16, #tpu.memory_space<vmem>>, vector<64x56xbf16>
    %cst_12 = arith.constant dense<0.000000e+00> : vector<16x56xf32>
    %14 = tpu.matmul %12, %13, %cst_12 {dimension_numbers = #tpu.dot_dimension_numbers<[1], [0], [0], [1], [0, 0, 1, 1], [], []>} : vector<16x64xbf16>, vector<64x56xbf16>, vector<16x56xf32> -> vector<16x56xf32>
    %15 = vector.broadcast %5 : vector<16x1xi32> to vector<16x56xi32>
    %16 = vector.broadcast %6 : vector<1x56xi32> to vector<16x56xi32>
    %17 = arith.cmpi eq, %15, %16 : vector<16x56xi32>
    %cst_13 = arith.constant -1.000000e+30 : f32
    %18 = vector.broadcast %cst_13 : f32 to vector<16x56xf32>
    %19 = arith.select %17, %14, %18 : vector<16x56xi1>, vector<16x56xf32>
    %cst_14 = arith.constant dense<0xFF800000> : vector<16xf32>
    %20 = vector.multi_reduction <maximumf>, %19, %cst_14 [1] : vector<16x56xf32> to vector<16xf32>
    %21 = vector.shape_cast %20 : vector<16xf32> to vector<16x1xf32>
    %22 = vector.broadcast %21 : vector<16x1xf32> to vector<16x56xf32>
    %23 = arith.subf %19, %22 : vector<16x56xf32>
    %24 = math.exp %23 : vector<16x56xf32>
    %cst_15 = arith.constant dense<0.000000e+00> : vector<16xf32>
    %25 = vector.multi_reduction <add>, %24, %cst_15 [1] : vector<16x56xf32> to vector<16xf32>
    %26 = vector.shape_cast %25 : vector<16xf32> to vector<16x1xf32>
    %27 = arith.truncf %24 : vector<16x56xf32> to vector<16x56xbf16>
    %c0_16 = arith.constant 0 : index
    %c0_17 = arith.constant 0 : index
    %28 = vector.load %arg4[%c0_16, %c0_17] : memref<56x32xbf16, #tpu.memory_space<vmem>>, vector<56x32xbf16>
    %cst_18 = arith.constant dense<0.000000e+00> : vector<16x32xf32>
    %29 = tpu.matmul %27, %28, %cst_18 {dimension_numbers = #tpu.dot_dimension_numbers<[1], [0], [0], [1], [0, 0, 1, 1], [], []>} : vector<16x56xbf16>, vector<56x32xbf16>, vector<16x32xf32> -> vector<16x32xf32>
    %30 = tpu.reciprocal %26 {approx = true} : vector<16x1xf32> -> vector<16x1xf32>
    %31 = vector.broadcast %30 : vector<16x1xf32> to vector<16x32xf32>
    %32 = arith.mulf %29, %31 : vector<16x32xf32>
    %33 = arith.extui %17 : vector<16x56xi1> to vector<16x56xi32>
    %34 = arith.sitofp %33 : vector<16x56xi32> to vector<16x56xf32>
    %cst_19 = arith.constant dense<0.000000e+00> : vector<16xf32>
    %35 = vector.multi_reduction <add>, %34, %cst_19 [1] : vector<16x56xf32> to vector<16xf32>
    %36 = vector.shape_cast %35 : vector<16xf32> to vector<16x1xf32>
    %cst_20 = arith.constant 0.000000e+00 : f32
    %37 = vector.broadcast %cst_20 : f32 to vector<16x1xf32>
    %38 = arith.cmpf ogt, %36, %37 : vector<16x1xf32>
    %39 = arith.extui %38 : vector<16x1xi1> to vector<16x1xi32>
    %40 = arith.sitofp %39 : vector<16x1xi32> to vector<16x1xf32>
    %41 = vector.broadcast %40 : vector<16x1xf32> to vector<16x32xf32>
    %42 = arith.mulf %32, %41 : vector<16x32xf32>
    %43 = arith.subf %4, %42 : vector<16x32xf32>
    %44 = arith.mulf %4, %42 : vector<16x32xf32>
    %45 = tpu.concatenate %4, %42, %43, %44 in 1 : vector<16x32xf32>, vector<16x32xf32>, vector<16x32xf32>, vector<16x32xf32> -> vector<16x128xf32>
    %46 = arith.truncf %45 : vector<16x128xf32> to vector<16x128xbf16>
    %c0_21 = arith.constant 0 : index
    %c0_22 = arith.constant 0 : index
    %47 = vector.load %arg11[%c0_21, %c0_22] : memref<128x32xbf16, #tpu.memory_space<vmem>>, vector<128x32xbf16>
    %cst_23 = arith.constant dense<0.000000e+00> : vector<16x32xf32>
    %48 = tpu.matmul %46, %47, %cst_23 {dimension_numbers = #tpu.dot_dimension_numbers<[1], [0], [0], [1], [0, 0, 1, 1], [], []>} : vector<16x128xbf16>, vector<128x32xbf16>, vector<16x32xf32> -> vector<16x32xf32>
    %c0_24 = arith.constant 0 : index
    %c0_25 = arith.constant 0 : index
    %49 = vector.load %arg12[%c0_24, %c0_25] : memref<1x32xf32, #tpu.memory_space<vmem>>, vector<1x32xf32>
    %50 = vector.broadcast %49 : vector<1x32xf32> to vector<16x32xf32>
    %51 = arith.addf %48, %50 : vector<16x32xf32>
    %52 = tpu.iota {dimensions = array<i32: 1>} : vector<16x4xi32>
    %53 = vector.broadcast %5 : vector<16x1xi32> to vector<16x4xi32>
    %54 = arith.cmpi eq, %53, %52 : vector<16x4xi32>
    %55 = arith.extui %54 : vector<16x4xi1> to vector<16x4xi32>
    %56 = arith.sitofp %55 : vector<16x4xi32> to vector<16x4xf32>
    %cst_26 = arith.constant dense<0.000000e+00> : vector<4x32xf32>
    %57 = tpu.matmul %56, %51, %cst_26 {dimension_numbers = #tpu.dot_dimension_numbers<[0], [0], [1], [1], [0, 1, 1, 1], [], []>} : vector<16x4xf32>, vector<16x32xf32>, vector<4x32xf32> -> vector<4x32xf32>
    %c0_27 = arith.constant 0 : index
    %c0_28 = arith.constant 0 : index
    %c0_29 = arith.constant 0 : index
    %58 = vector.load %arg13[%c0_27, %c0_28, %c0_29] : memref<1x4x32xf32, #tpu.memory_space<vmem>>, vector<1x4x32xf32>
    %59 = vector.shape_cast %58 : vector<1x4x32xf32> to vector<4x32xf32>
    %60 = arith.addf %59, %57 : vector<4x32xf32>
    %c0_30 = arith.constant 0 : index
    %c0_31 = arith.constant 0 : index
    %c0_32 = arith.constant 0 : index
    %61 = vector.load %arg13[%c0_30, %c0_31, %c0_32] : memref<1x4x32xf32, #tpu.memory_space<vmem>>, vector<1x4x32xf32>
    %62 = vector.shape_cast %61 : vector<1x4x32xf32> to vector<4x32xf32>
    %63 = vector.shape_cast %60 : vector<4x32xf32> to vector<1x4x32xf32>
    tpu.vector_store %arg13[%c0_30, %c0_31, %c0_32], %63 {strides = array<i32>} : memref<1x4x32xf32, #tpu.memory_space<vmem>>, vector<1x4x32xf32>,
    return
  }
  func.func @transform_0(%arg0: i32, %arg1: i32) -> (i32, i32) {
    %c2_i32 = arith.constant 2 : i32
    %0 = arith.muli %arg0, %c2_i32 : i32
    %1 = arith.addi %0, %arg1 : i32
    %c0_i32 = arith.constant 0 : i32
    %c0_i32_0 = arith.constant 0 : i32
    return %1, %c0_i32 : i32, i32
  }
  func.func @transform_1(%arg0: i32, %arg1: i32) -> (i32, i32) {
    %c2_i32 = arith.constant 2 : i32
    %0 = arith.muli %arg0, %c2_i32 : i32
    %1 = arith.addi %0, %arg1 : i32
    %c0_i32 = arith.constant 0 : i32
    %c0_i32_0 = arith.constant 0 : i32
    return %1, %c0_i32 : i32, i32
  }
  func.func @transform_2(%arg0: i32, %arg1: i32) -> (i32, i32) {
    %c0_i32 = arith.constant 0 : i32
    %c0_i32_0 = arith.constant 0 : i32
    %c0_i32_1 = arith.constant 0 : i32
    return %c0_i32, %c0_i32_0 : i32, i32
  }
  func.func @transform_3(%arg0: i32, %arg1: i32) -> (i32, i32) {
    %c0_i32 = arith.constant 0 : i32
    %c0_i32_0 = arith.constant 0 : i32
    %c0_i32_1 = arith.constant 0 : i32
    return %c0_i32, %c0_i32_0 : i32, i32
  }
  func.func @transform_4(%arg0: i32, %arg1: i32) -> (i32, i32) {
    %c0_i32 = arith.constant 0 : i32
    %c0_i32_0 = arith.constant 0 : i32
    %c0_i32_1 = arith.constant 0 : i32
    return %c0_i32, %c0_i32_0 : i32, i32
  }
  func.func @transform_5(%arg0: i32, %arg1: i32) -> (i32, i32) {
    %c0_i32 = arith.constant 0 : i32
    %c0_i32_0 = arith.constant 0 : i32
    %c0_i32_1 = arith.constant 0 : i32
    return %c0_i32, %c0_i32_0 : i32, i32
  }
  func.func @transform_6(%arg0: i32, %arg1: i32) -> (i32, i32) {
    %c0_i32 = arith.constant 0 : i32
    %c0_i32_0 = arith.constant 0 : i32
    %c0_i32_1 = arith.constant 0 : i32
    return %c0_i32, %c0_i32_0 : i32, i32
  }
  func.func @transform_7(%arg0: i32, %arg1: i32) -> (i32, i32) {
    %c0_i32 = arith.constant 0 : i32
    %c0_i32_0 = arith.constant 0 : i32
    %c0_i32_1 = arith.constant 0 : i32
    return %c0_i32, %c0_i32_0 : i32, i32
  }
  func.func @transform_8(%arg0: i32, %arg1: i32) -> (i32, i32) {
    %c0_i32 = arith.constant 0 : i32
    %c0_i32_0 = arith.constant 0 : i32
    %c0_i32_1 = arith.constant 0 : i32
    return %c0_i32, %c0_i32_0 : i32, i32
  }
  func.func @transform_9(%arg0: i32, %arg1: i32) -> (i32, i32) {
    %c0_i32 = arith.constant 0 : i32
    %c0_i32_0 = arith.constant 0 : i32
    %c0_i32_1 = arith.constant 0 : i32
    return %c0_i32, %c0_i32_0 : i32, i32
  }
  func.func @transform_10(%arg0: i32, %arg1: i32) -> (i32, i32) {
    %c0_i32 = arith.constant 0 : i32
    %c0_i32_0 = arith.constant 0 : i32
    %c0_i32_1 = arith.constant 0 : i32
    return %c0_i32, %c0_i32_0 : i32, i32
  }
  func.func @transform_11(%arg0: i32, %arg1: i32) -> (i32, i32, i32) {
    %c0_i32 = arith.constant 0 : i32
    %c0_i32_0 = arith.constant 0 : i32
    %c0_i32_1 = arith.constant 0 : i32
    return %arg0, %c0_i32, %c0_i32_0 : i32, i32, i32
  }
}

</mosaic_0001>

<bundles_post_ra>
// kernel: tpu_custom_call.1
= control target key start
LH: loop header
LB: loop body
LE: loop exit
PB: predicated region body
PF: predicated region fallthrough
CT: control target
= control target key end

     0   :  { %16 = vsyncpa [#allocation4], 0  ;;  %s2119_s0 = inlined_call_operand.vmem [shape: bf16[64,32], index: 0, kind: input, shape index: {}]   ;;  %s2120_s1 = inlined_call_operand.vmem [shape: s32[64,1], index: 1, kind: input, shape index: {}]   ;;  %s2121_s2 = inlined_call_operand.vmem [shape: bf16[56,32], index: 2, kind: input, shape index: {}]   ;;  %s2122_s3 = inlined_call_operand.vmem [shape: bf16[32,56], index: 3, kind: input, shape index: {}]   ;;  %s2123_s4 = inlined_call_operand.vmem [shape: s32[1,56], index: 4, kind: input, shape index: {}]   ;;  %s2124_s5 = inlined_call_operand.vmem [shape: bf16[32,64], index: 5, kind: input, shape index: {}]   ;;  %s2125_s6 = inlined_call_operand.vmem [shape: f32[1,64], index: 6, kind: input, shape index: {}]   ;;  %s2126_s7 = inlined_call_operand.vmem [shape: bf16[64,32], index: 7, kind: input, shape index: {}]   ;;  %s2127_s8 = inlined_call_operand.vmem [shape: f32[64,1], index: 8, kind: input, shape index: {}]   ;;  %s2128_s9 = inlined_call_operand.vmem [shape: bf16[128,32], index: 9, kind: input, shape index: {}]   ;;  %s2129_s10 = inlined_call_operand.vmem [shape: f32[1,32], index: 10, kind: input, shape index: {}]   ;;  %s2130_s11 = inlined_call_operand.hbm [shape: f32[2,4,32], index: 11, kind: output, shape index: {}]  }
   0x1   :  { %18 = vsyncpa [#allocation4 + $0x1], 0  ;;  %s1798_s17 = smov 0   ;;  %s1800_s18 = smov 0  }
   0x2   :  { %s1802_s19 = smov 0   ;;  %s1804_s20 = smov 0  }
   0x3   :  { %s1806_s21 = smov 0   ;;  %s1808_s22 = smov 0  }
   0x4   :  { %s1810_s23 = smov 0   ;;  %s1812_s24 = smov 0  }
   0x5 LB: > { %2138 = sst [smem:[#allocation6_spill]] %s1699_s17  ;;  %s1319_s25 = sadd.s32 4294967295, %s1727_s24   ;;  %s1727_s24 = sphi %s1812_s24, %s24_s24   ;;  %s1723_s23 = sphi %s1810_s23, %s2156_s23   ;;  %s1719_s22 = sphi %s1808_s22, %s2155_s22   ;;  %s1715_s21 = sphi %s1806_s21, %s2159_s21   ;;  %s1711_s20 = sphi %s1804_s20, %s2153_s20   ;;  %s1707_s19 = sphi %s1802_s19, %s2152_s19   ;;  %s1703_s18 = sphi %s1800_s18, %s2158_s18   ;;  %s1699_s17 = sphi %s1798_s17, %s2157_s17  }
   0x6   : > { %2139 = sst [smem:[#allocation7_spill]] %s1707_s19  ;;  %s1320_s26 = sadd.s32 4294967294, %s1727_s24  }
   0x7   : > { %2140 = sst [smem:[#allocation8_spill]] %s1719_s22  ;;  %s33_s27 = sadd.s32 1, %s1719_s22 }
   0x8   : > { %2141 = sst [smem:[#allocation9_spill]] %s1723_s23  ;;  %p34_p0 = scmp.ge.s32.totalorder %s33_s27, 2 }
   0x9   : > { %s36_s28 = sadd.s32 1, %s1723_s23  ;;  %p302_p1 = scmp.ne.s32.totalorder %s1707_s19, %s1703_s18 }
   0xa   : > { %p303_p2 = scmp.eq.s32.totalorder %s1319_s25, 3  ;;  %s2161_s27 = smov (%p34_p0, %s33_s27), 0 }
   0xb   : > { %2142 = sst [smem:[#allocation10_spill]] %s2161_s27  ;;  %s2163_s28 = smov (!%p34_p0, %s36_s28), %s1723_s23 }
   0xc   : > { %p1847_p3 = por %p303_p2, %p302_p1  ;;  %p308_p4 = scmp.ne.s32.totalorder %s1703_s18, %s1699_s17 }
   0xd   : > { %p38_p5 = scmp.ge.s32.totalorder %s2163_s28, 2  ;;  %p309_p6 = scmp.eq.s32.totalorder %s1320_s26, 3 }
   0xe   : > { %p1327_p7 = scmp.ge.s32.totalorder %s1727_s24, 1  ;;  %p380_p8 = scmp.lt.s32.totalorder %s1727_s24, 5 }
   0xf   : > { %s2165_s28 = smov (%p38_p5, %s2163_s28), 0  ;;  %p1857_p9 = por %p309_p6, %p308_p4 }
  0x10   : > { %2144 = sst [smem:[#allocation11_spill]] %s2165_s28  ;;  %p381_p10 = pnand %p1327_p7, %p380_p8 }
  0x11   : > { %s2145_s30 = scalar_select %p1857_p9, 1, 0 }
  0x12   : > { %s289_s12 = ssub.s32 %s1723_s23, %s2165_s28  ;;  %s292_s13 = sadd.s32 1, %s1707_s19 }
  0x13   : > { %2146 = sst [smem:[#allocation12_spill]] %s2145_s30  ;;  %p290_p11 = scmp.eq.s32.totalorder %s289_s12, 0 }
  0x14   : > { %384 = sbr.rel (%p381_p10) target bundleno = 1550 (0x60e), region = 64  ;;  %s2137_s15 = sand.u32 (!%p381_p10), 1, %s1703_s18  }
  0x15   : > { %s1865_s14 = scalar_select %p290_p11, %s1707_s19, %s292_s13  }
  0x16   : > { %s1329_s16 = sshll.u32 (!%p381_p10), %s1715_s21, 1  ;;  %s1328_s25 = sshll.u32 (!%p381_p10), %s2137_s15, 2 }
  0x17   : > { %2147 = sst [smem:[#allocation13_spill]] %s1865_s14  ;;  %s430_s26 = sadd.s32 (!%p381_p10), %s1711_s20, %s1329_s16 }
  0x18   : > { %s1330_s27 = sshll.u32 (!%p381_p10), %s430_s26, 1  ;;  %s1882_s17 = scalar_lea.vmem (!%p381_p10), [#allocation3], %s1328_s25 }
  0x19   : > { %p432_p12 = scmp.lt.s32.totalorder %s1330_s27, 7  ;;  %p1335_p13 = scmp.ne.s32.totalorder %s1711_s20, 0 }
  0x1b   : > { %s2167_s27 = smov (!%p432_p12, %s1330_s27), 7  ;;  %453 = sbr.rel (%p1335_p13) target bundleno = 245 (0xf5), region = 68 }
  0x1c   : > { %s1331_s22 = sshll.u32 %s2167_s27, 2  ;;  %s1334_s30 = sshll.u32 %s2167_s27, 3 }
  0x1d   : > { %s1875_s12 = scalar_lea.vmem %s2119_s0, %s1331_s22  ;;  %s1880_s19 = scalar_lea.vmem %s2120_s1, %s1334_s30 }
  0x20   : > { %v1585_v0 = vld [vmem:[%s2122_s3 + $0x8] sm:$0xff]   ;;  %v1586_v1 = vld [vmem:[%s2122_s3] sm:$0xff]   ;;  %vm546_vm0 = vcmask 261120   ;;  %v1588_v3 = vld [vmem:[%s2126_s7 + $0x10] sm:$0xff]   ;;  %v1729_v6 = vmov 0   ;;  %vm665_vm1 = vcmask 257024  }
  0x21   : > { %1429 = vmatprep.subr.bf16.mxu0 %v1585_v0  ;;  %1500 = vmatprep.subr.bf16.mxu1 %v1585_v0  ;;  %v1587_v2 = vld [vmem:[%s2126_s7] sm:$0xff]   ;;  %v1589_v4 = vld [vmem:[%s2126_s7 + $0x8] sm:$0xff]   ;;  %v1590_v5 = vld [vmem:[%s2126_s7 + $0x18] sm:$0xff]   ;;  %v1730_v15 = vmov 0.0   ;;  %vm656_vm2 = vcmask 453632  }
  0x22   : > { %1430 = vmatpush3.bf16.msra.mxu0 %v1585_v0  ;;  %1502 = vmatpush3.bf16.msra.mxu1 %v1585_v0  ;;  %v468_v7 = vld [vmem:[%s2127_s8 + $0x10] sm:$0xff]  ;;  %v466_v8 = vld [vmem:[%s2127_s8] sm:$0xff]  ;;  %v469_v9 = vld [vmem:[%s2127_s8 + $0x18] sm:$0xff]  ;;  %666 = vst.msk [vmem:[%s1882_s17] sm:$0xf] %vm665_vm1, %v1730_v15 }
  0x23   : > { %1431 = vmatprep.subr.bf16.mxu0 %v1586_v1  ;;  %1501 = vmatprep.subr.bf16.mxu1 %v1586_v1  ;;  %v467_v10 = vld [vmem:[%s2127_s8 + $0x8] sm:$0xff]  ;;  %v470_v12 = vld [vmem:[%s2127_s8 + $0x20] sm:$0xff]  ;;  %v473_v13 = vld [vmem:[%s2127_s8 + $0x38] sm:$0xff] }
  0x24   : > { %1433 = vmatprep.mubr.msk.bf16.mxu0 %vm546_vm0, %v1587_v2  ;;  %1437 = vmatprep.mubr.msk.bf16.mxu1 %vm546_vm0, %v1588_v3  ;;  %v471_v11 = vld [vmem:[%s2127_s8 + $0x28] sm:$0xff]  ;;  %v472_v14 = vld [vmem:[%s2127_s8 + $0x30] sm:$0xff] }
  0x25   : > { %1584 = vset.pattern.permute.xlu1 %v1729_v6  ;;  %1583 = vset.pattern.permute.xlu0 %v1729_v6 }
  0x26   : > { %1432 = vmatpush3.bf16.msra.mxu0 %v1586_v1  ;;  %1503 = vmatpush3.bf16.msra.mxu1 %v1586_v1 }
  0x27   : > { %486 = vperm.xlu1 %1584, %v468_v7   ;;  %476 = vperm.xlu0 %1583, %v466_v8  }
  0x29   : > { %1434 = vmatmul.mubr.msk.bf16.vlgmr.msra.gmra.mxu0 %vm546_vm0, %v1589_v4  ;;  %1438 = vmatmul.mubr.msk.bf16.vlgmr.msra.gmra.mxu1 %vm546_vm0, %v1590_v5 }
  0x2b   : > { %491 = vperm.xlu1 %1584, %v469_v9   ;;  %481 = vperm.xlu0 %1583, %v467_v10  }
  0x2f   : > { %501 = vperm.xlu1 %1584, %v471_v11   ;;  %496 = vperm.xlu0 %1583, %v470_v12  }
  0x33   : > { %511 = vperm.xlu1 %1584, %v473_v13   ;;  %506 = vperm.xlu0 %1583, %v472_v14  }
  0xa2   : > { %v477_v16 = vpop.permute.xlu0 %476  ;;  %v487_v17 = vpop.permute.xlu1 %486 }
  0xa6   : > { %v482_v18 = vpop.permute.xlu0 %481  ;;  %v492_v19 = vpop.permute.xlu1 %491 }
  0xaa   : > { %v497_v20 = vpop.permute.xlu0 %496  ;;  %v502_v21 = vpop.permute.xlu1 %501 }
  0xae   : > { %v507_v22 = vpop.permute.xlu0 %506  ;;  %v512_v29 = vpop.permute.xlu1 %511 }
  0xe9   : > { %v1435_v23 = vpop.f32.mrf.mxu0  ;;  %v1439_v24 = vpop.f32.mrf.mxu1 }
  0xea   : > { %v602_v25 = vadd.f32 %v1435_v23, %v487_v17  ;;  %v618_v26 = vadd.f32 %v1439_v24, %v507_v22 }
  0xeb   : > { %v593_v27 = vpop.f32.mrf.mxu0  ;;  %v609_v28 = vpop.f32.mrf.mxu1 }
  0xec   : > { %v1392_v30 = vpack.c.bf16 %v602_v25, %v602_v25  ;;  %v1396_v31 = vpack.c.bf16 %v618_v26, %v618_v26  ;;  %v594_v32 = vadd.f32 %v593_v27, %v477_v16  ;;  %v610_v33 = vadd.f32 %v609_v28, %v497_v20 }
  0xed   : > { %v1436_v34 = vpop.f32.mrf.mxu0  ;;  %v1440_v35 = vpop.f32.mrf.mxu1 }
  0xee   : > { %659 = vst.msk [vmem:[#allocation2 + $0x8] sm:$0xf] %vm656_vm2, %v1392_v30  ;;  %663 = vst.msk [vmem:[#allocation2 + $0x18] sm:$0xf] %vm656_vm2, %v1396_v31  ;;  %v1390_v36 = vpack.c.bf16 %v594_v32, %v594_v32  ;;  %v1394_v37 = vpack.c.bf16 %v610_v33, %v610_v33  ;;  %v605_v38 = vadd.f32 %v1436_v34, %v492_v19 }
  0xef   : > { %v621_v39 = vadd.f32 %v1440_v35, %v512_v29  ;;  %v596_v40 = vpop.f32.mrf.mxu0  ;;  %v612_v41 = vpop.f32.mrf.mxu1 }
  0xf0   : > { %657 = vst.msk [vmem:[#allocation2] sm:$0xf] %vm656_vm2, %v1390_v36  ;;  %661 = vst.msk [vmem:[#allocation2 + $0x10] sm:$0xf] %vm656_vm2, %v1394_v37  ;;  %v1393_v42 = vpack.c.bf16 %v605_v38, %v605_v38  ;;  %v597_v44 = vadd.f32 %v596_v40, %v482_v18  ;;  %v613_v45 = vadd.f32 %v612_v41, %v502_v21 }
  0xf1   : > { %v1397_v43 = vpack.c.bf16 %v621_v39, %v621_v39 }
  0xf2   : > { %660 = vst.msk [vmem:[#allocation2 + $0xc] sm:$0xf] %vm656_vm2, %v1393_v42  ;;  %v1391_v46 = vpack.c.bf16 %v597_v44, %v597_v44  ;;  %v1395_v47 = vpack.c.bf16 %v613_v45, %v613_v45 }
  0xf3   : > { %664 = vst.msk [vmem:[#allocation2 + $0x1c] sm:$0xf] %vm656_vm2, %v1397_v43 }
  0xf4   : > { %658 = vst.msk [vmem:[#allocation2 + $0x4] sm:$0xf] %vm656_vm2, %v1391_v46  ;;  %662 = vst.msk [vmem:[#allocation2 + $0x14] sm:$0xf] %vm656_vm2, %v1395_v47 }
  0xf5 PF: > { %v1607_v48 = vld [vmem:[%s2124_s5 + $0x8] sm:$0xff]   ;;  %v1731_v49 = vmov 0.0   ;;  %v1608_v50 = vld [vmem:[%s2124_s5] sm:$0xff]   ;;  %vm1732_vm3 = vmmov 0   ;;  %vm702_vm4 = vcmask 261120   ;;  %v1733_v57 = vmov 0  }
  0xf6   : > { %1441 = vmatprep.subr.bf16.mxu1 %v1731_v49  ;;  %1449 = vmatprep.subr.bf16.mxu0 %v1731_v49  ;;  %v1951_v51 = vld [vmem:[%s1875_s12] sm:$0xff]   ;;  %v672_v58 = vld [vmem:[%s1880_s19 + $0x8] sm:$0xff]  ;;  %vm780_vm5 = vcmask 523264   ;;  %vm839_vm7 = vcmask 457728   ;;  %v1614_v14 = vld [vmem:[%s2121_s2 + $0x18] ss:$0 sps:$4 sm:$0xff]  }
  0xf7   : > { %1442 = vmatpush3.bf16.msra.mxu1 %v1607_v48  ;;  %1445 = vmatprep.mubr.msk.bf16.mxu1 %vm1732_vm3, %v1731_v49  ;;  %v671_v56 = vld [vmem:[%s1880_s19] sm:$0xff]  ;;  %vm890_vm9 = vcmask 1043456   ;;  %v1615_v16 = vld [vmem:[%s2121_s2 + $0x10] sm:$0xff]   ;;  %v1616_v17 = vld [vmem:[%s2121_s2 + $0x8] sm:$0xff]   ;;  %s1734_s12 = smov 32   ;;  %s1735_s30 = smov 96  }
  0xf8   : > { %1443 = vmatprep.subr.bf16.mxu1 %v1731_v49  ;;  %1457 = vmatprep.mubr.msk.bf16.mxu0 %vm1732_vm3, %v1731_v49  ;;  %v1354_v60 = vld [vmem:[%s2125_s6] ss:$0 sm:$0xff]  ;;  %v892_v15 = vsel %vm890_vm9, %v1614_v14, 0  ;;  %v1618_v34 = vld [vmem:[%s2128_s9 + $0x38] sm:$0xff]   ;;  %v1619_v35 = vld [vmem:[%s2128_s9 + $0x30] sm:$0xff]   ;;  %s1736_s19 = smov 64  }
  0xf9   : > { %v1612_v54 = vld [vmem:[#allocation2 + $0x8] sm:$0xff]   ;;  %1591 = vset.pattern.permute.xlu0 %v1733_v57  ;;  %v1364_v4 = vld [vmem:[%s2123_s4] ss:$0 sm:$0xff]  ;;  %v1622_v38 = vld [vmem:[%s2128_s9 + $0x18] sm:$0xff]   ;;  %vm989_vm14 = vcmask 785408   ;;  %vm1145_vm15 = vcmask 130048  }
  0xfa   : > { %v1610_v52 = vld [vmem:[#allocation2 + $0x18] sm:$0xff]   ;;  %826 = vperm.xlu0 %1591, %v671_v56   ;;  %v1617_v18 = vld [vmem:[%s2121_s2] sm:$0xff]   ;;  %v1620_v36 = vld [vmem:[%s2128_s9 + $0x28] sm:$0xff]   ;;  %v670_v56 = vunpack.c.h.bf16 %v1951_v51  ;;  %s1387_s25 = sshll.u32 %s1715_s21, 6  ;;  %s1237_s13 = sshll.u32 %s1882_s17, 4  ;;  %vm1221_vm0 = vcmask 257024   ;;  %s1238_s13 = int_to_ptr.vmem [resolvable:$true] %s1237_s13 }
  0xfb   : > { %v1611_v53 = vld [vmem:[#allocation2 + $0x10] sm:$0xff]   ;;  %1450 = vmatpush3.bf16.msra.mxu0 %v1610_v52  ;;  %1444 = vmatpush3.bf16.msra.mxu1 %v1608_v50  ;;  %v1613_v55 = vld [vmem:[#allocation2] sm:$0xff]   ;;  %v1624_v43 = vld [vmem:[%s2128_s9 + $0x8] sm:$0xff]   ;;  %s2070_s27 = scalar_lea.hbm %s2130_s11, %s1387_s25  ;;  %s2148_s22 = sand.u32 1, %s1703_s18  }
  0xfc   : > { %1451 = vmatprep.subr.bf16.mxu0 %v1731_v49  ;;  %1473 = vmatprep.subr.bf16.mxu1 %v1731_v49  ;;  %v1621_v37 = vld [vmem:[%s2128_s9 + $0x20] sm:$0xff]   ;;  %v1623_v39 = vld [vmem:[%s2128_s9 + $0x10] sm:$0xff]   ;;  %s1224_s23 = scalar_lea.sflag [#allocation4], %s2148_s22  ;;  %s1635_s28 = scalar_lea.vmem %s1238_s13, 64 }
  0xfd   : > { %v1625_v50 = vld [vmem:[%s2128_s9] sm:$0xff]   ;;  %p1636_p0 = scmp.ne.s32.totalorder %s1238_s13, %s1635_s28  ;;  %s1737_s21 = smov [#allocation3]  }
  0xfe   : > { %1446 = vmatmul.mubr.msk.bf16.vlgmr.msra.gmra.mxu1 %vm702_vm4, %v1951_v51  ;;  %829 = vperm.xlu0 %1591, %v672_v58   ;;  %s1639_s20 = sshll.u32 %s1737_s21, 4  ;;  %s1640_s20 = int_to_ptr.vmem [resolvable:$false] %s1639_s20 }
  0xff   : > { %1452 = vmatpush3.bf16.msra.mxu0 %v1611_v53  ;;  %1489 = vmatprep.mubr.msk.bf16.mxu1 %vm1732_vm3, %v1731_v49  ;;  %p1637_p1 = pnand %p1636_p0, %p1847_p3  ;;  %p1642_p4 = scmp.lt.s32.totalorder %s1238_s13, %s1640_s20 }
 0x100   : > { %1453 = vmatprep.subr.bf16.mxu0 %v1731_v49  ;;  %1474 = vmatpush3.bf16.msra.mxu1 %v1618_v34 }
 0x101   : > { %1475 = vmatprep.subr.bf16.mxu1 %v1731_v49  ;;  %p1638_p2 = pneg %p1637_p1 }
 0x103   : > { %1454 = vmatpush3.bf16.msra.mxu0 %v1612_v54 }
 0x104   : > { %1455 = vmatprep.subr.bf16.mxu0 %v1731_v49  ;;  %1476 = vmatpush3.bf16.msra.mxu1 %v1619_v35 }
 0x105   : > { %1477 = vmatprep.subr.bf16.mxu1 %v1731_v49 }
 0x107   : > { %1456 = vmatpush3.bf16.msra.mxu0 %v1613_v55  ;;  %v669_v55 = vunpack.c.l.bf16 %v1951_v51  ;;  %v1105_v51 = vlaneseq }
 0x108   : > { %1461 = vmatprep.subr.bf16.mxu0 %v1731_v49  ;;  %1478 = vmatpush3.bf16.msra.mxu1 %v1620_v36 }
 0x109   : > { %1479 = vmatprep.subr.bf16.mxu1 %v1731_v49 }
 0x10c   : > { %1480 = vmatpush3.bf16.msra.mxu1 %v1621_v37 }
 0x10d   : > { %1481 = vmatprep.subr.bf16.mxu1 %v1731_v49 }
 0x110   : > { %1482 = vmatpush3.bf16.msra.mxu1 %v1622_v38 }
 0x111   : > { %1483 = vmatprep.subr.bf16.mxu1 %v1731_v49 }
 0x114   : > { %1484 = vmatpush3.bf16.msra.mxu1 %v1623_v39 }
 0x115   : > { %1485 = vmatprep.subr.bf16.mxu1 %v1731_v49 }
 0x118   : > { %1486 = vmatpush3.bf16.msra.mxu1 %v1624_v43 }
 0x119   : > { %1487 = vmatprep.subr.bf16.mxu1 %v1731_v49 }
 0x11c   : > { %1488 = vmatpush3.bf16.msra.mxu1 %v1625_v50 }
 0x175   : > { %v1973_v3 = vpop.permute.xlu0 %826 }
 0x176   : > { %vm835_vm6 = vcmp.eq.s32.totalorder %v1973_v3, %v1364_v4 }
 0x177   : > { %v1370_v30 = vsel %vm835_vm6, 1.0, %v1731_v49 }
 0x178   : > { %v943_v31 = vsel %vm839_vm7, %v1370_v30, 0.0 }
 0x179   : > { %v1979_v6 = vpop.permute.xlu0 %829 }
 0x17a   : > { %vm836_vm8 = vcmp.eq.s32.totalorder %v1979_v6, %v1364_v4 }
 0x17b   : > { %v1371_v32 = vsel %vm836_vm8, 1.0, %v1731_v49 }
 0x17c   : > { %v946_v33 = vsel %vm839_vm7, %v1371_v32, 0.0  ;;  %v1219_v32 = vld [vmem:[%s1882_s17] sm:$0xf] }
 0x1be   : > { %v740_v59 = vpop.f32.mrf.mxu1 }
 0x1bf   : > { %v741_v63 = vadd.f32 %v1354_v60, %v740_v59 }
 0x1c0   : > { %v1447_v61 = vpop.f32.mrf.mxu1 }
 0x1c2   : > { %v743_v62 = vpop.f32.mrf.mxu1 }
 0x1c3   : > { %v744_v0 = vadd.f32 %v1354_v60, %v743_v62 }
 0x1c4   : > { %v1448_v1 = vpop.f32.mrf.mxu1 }
 0x1c5   : > { %v747_v2 = vpack.c.bf16 %v744_v0, %v741_v63 }
 0x1c7   : > { %1458 = vmatmul.mubr.msk.bf16.vlgmr.msra.gmra.mxu0 %vm780_vm5, %v747_v2 }
 0x1c8   : > { %1469 = vmatprep.mubr.msk.bf16.mxu0 %vm1732_vm3, %v1731_v49  ;;  %1462 = vmatpush3.bf16.msra.mxu0 %v892_v15 }
 0x1c9   : > { %1463 = vmatprep.subr.bf16.mxu0 %v1731_v49 }
 0x1cc   : > { %1464 = vmatpush3.bf16.msra.mxu0 %v1615_v16 }
 0x1cd   : > { %1465 = vmatprep.subr.bf16.mxu0 %v1731_v49 }
 0x1d0   : > { %1466 = vmatpush3.bf16.msra.mxu0 %v1616_v17 }
 0x1d1   : > { %1467 = vmatprep.subr.bf16.mxu0 %v1731_v49 }
 0x1d4   : > { %1468 = vmatpush3.bf16.msra.mxu0 %v1617_v18 }
 0x1d5   : > { %1493 = vmatprep.subr.mxu0 %v1731_v49 }
 0x287   : > { %v818_v5 = vpop.f32.mrf.mxu0 }
 0x288   : > { %v837_v7 = vsel %vm835_vm6, %v818_v5, -1e+30 }
 0x289   : > { %v1459_v8 = vpop.f32.mrf.mxu0  ;;  %v840_v9 = vsel %vm839_vm7, %v837_v7, -inf }
 0x28a   : > { %841 = vmax.xlane.f32.xlu1 %v840_v9 }
 0x28b   : > { %v821_v10 = vpop.f32.mrf.mxu0 }
 0x28c   : > { %v838_v11 = vsel %vm836_vm8, %v821_v10, -1e+30 }
 0x28d   : > { %v1460_v12 = vpop.f32.mrf.mxu0  ;;  %v843_v13 = vsel %vm839_vm7, %v838_v11, -inf }
 0x28e   : > { %844 = vmax.xlane.f32.xlu1 %v843_v13 }
 0x313   : > { %v842_v19 = vpop.xlane.xlu1 %841 }
 0x314   : > { %v846_v20 = vsub.f32 %v837_v7, %v842_v19  ;;  %v1106_v7 = vand.u32 127, %v1105_v51 }
 0x316   : > { %v848_v21 = vmul.f32 1.442695, %v846_v20  ;;  %vm1107_vm12 = vcmp.eq.s32.totalorder %v1973_v3, %v1106_v7  ;;  %vm1108_vm13 = vcmp.eq.s32.totalorder %v1979_v6, %v1106_v7 }
 0x317   : > { %v845_v22 = vpop.xlane.xlu1 %844  ;;  %v1383_v8 = vsel %vm1107_vm12, 1.0, %v1731_v49  ;;  %v1384_v9 = vsel %vm1108_vm13, 1.0, %v1731_v49 }
 0x318   : > { %1627 = vpow2.f32 %v848_v21  ;;  %v847_v23 = vsub.f32 %v838_v11, %v845_v22 }
 0x31a   : > { %v850_v24 = vmul.f32 1.442695, %v847_v23 }
 0x31c   : > { %1629 = vpow2.f32 %v850_v24 }
 0x325   : > { %v1628_v25 = vpop.eup %1627 }
 0x326   : > { %v852_v26 = vsel %vm839_vm7, %v1628_v25, 0.0 }
 0x327   : > { %853 = vadd.xlane.f32.xlu0 %v852_v26  ;;  %v1374_v26 = vld [vmem:[%s2129_s10] ss:$0 sm:$0xff] }
 0x329   : > { %v1630_v27 = vpop.eup %1629 }
 0x32a   : > { %v855_v28 = vsel %vm839_vm7, %v1630_v27, 0.0  ;;  %v858_v29 = vpack.c.bf16 %v1630_v27, %v1628_v25 }
 0x32b   : > { %856 = vadd.xlane.f32.xlu1 %v855_v28 }
 0x32c   : > { %1470 = vmatmul.mubr.msk.bf16.vlgmr.msra.gmra.mxu0 %vm839_vm7, %v858_v29 }
 0x32d   : > { %1497 = vmatprep.mubr.msk.f32.mxu0 %vm1732_vm3, %v1731_v49 }
 0x32f   : > { %944 = vadd.xlane.f32.xlu1 %v943_v31 }
 0x333   : > { %947 = vadd.xlane.f32.xlu1 %v946_v33 }
 0x3b0   : > { %v854_v40 = vpop.xlane.xlu0 %853 }
 0x3b1   : > { %1631 = vrcp.f32 %v854_v40 }
 0x3b4   : > { %v857_v41 = vpop.xlane.xlu1 %856 }
 0x3b5   : > { %1633 = vrcp.f32 %v857_v41 }
 0x3b8   : > { %v945_v42 = vpop.xlane.xlu1 %944 }
 0x3b9   : > { %vm949_vm10 = vcmp.gt.f32.partialorder %v945_v42, 0.0 }
 0x3ba   : > { %v1372_v53 = vsel %vm949_vm10, 1.0, %v1731_v49 }
 0x3bc   : > { %v948_v45 = vpop.xlane.xlu1 %947 }
 0x3bd   : > { %vm950_vm11 = vcmp.gt.f32.partialorder %v948_v45, 0.0 }
 0x3be   : > { %v1632_v44 = vpop.eup %1631  ;;  %v1373_v59 = vsel %vm950_vm11, 1.0, %v1731_v49 }
 0x3c2   : > { %v1634_v52 = vpop.eup %1633 }
 0x3ec   : > { %v928_v46 = vpop.f32.mrf.mxu0 }
 0x3ed   : > { %v937_v47 = vmul.f32 %v1632_v44, %v928_v46 }
 0x3ee   : > { %v1471_v48 = vpop.f32.mrf.mxu0 }
 0x3ef   : > { %v955_v57 = vmul.f32 %v1372_v53, %v937_v47 }
 0x3f0   : > { %v931_v54 = vpop.f32.mrf.mxu0 }
 0x3f1   : > { %v938_v58 = vmul.f32 %v1634_v52, %v931_v54  ;;  %v959_v63 = vmul.f32 %v955_v57, %v669_v55  ;;  %v957_v4 = vsub.f32 %v669_v55, %v955_v57 }
 0x3f2   : > { %v1472_v60 = vpop.f32.mrf.mxu0 }
 0x3f3   : > { %v956_v61 = vmul.f32 %v1373_v59, %v938_v58 }
 0x3f5   : > { %v1592_v62 = vpack.i.bf16 %v956_v61, %v955_v57  ;;  %v960_v0 = vmul.f32 %v956_v61, %v670_v56  ;;  %v958_v1 = vsub.f32 %v670_v56, %v956_v61 }
 0x3f7   : > { %1593 = vrot.lane.b32.xlu1 %v1592_v62, %s1734_s12  ;;  %v1602_v2 = vpack.i.bf16 %v960_v0, %v959_v63  ;;  %v1597_v5 = vpack.i.bf16 %v958_v1, %v957_v4  ;;  %s1641_s12 = scalar_lea.vmem %s1640_s20, 128 }
 0x3f8   : > { %p1643_p5 = scmp.lt.s32.totalorder %s1641_s12, %s1635_s28 }
 0x3f9   : > { %1603 = vrot.lane.b32.xlu0 %v1602_v2, %s1735_s30 }
 0x3fa   : > { %p1644_p6 = por %p1643_p5, %p1642_p4 }
 0x3fb   : > { %1598 = vrot.lane.b32.xlu1 %v1597_v5, %s1736_s19 }
 0x3fc   : > { %p1645_p7 = pnand %p1644_p6, %p1638_p2 }
 0x424   : > { %1113 = vxpose.xlu1.b32.start [1/2] (short) (narrow) %v1383_v8, 8 }
 0x428   : > { %1114 = vxpose.xlu1.b32.end [2/2] (short) (narrow) %v1384_v9, 8 }
 0x469   : > { %v1594_v10 = vpop.permute.xlu1 %1593 }
 0x46a   : > { %v1596_v11 = vunpack.i.h.bf16 %v1594_v10  ;;  %v1595_v12 = vunpack.i.l.bf16 %v1594_v10 }
 0x46b   : > { %v1604_v13 = vpop.permute.xlu0 %1603 }
 0x46c   : > { %v986_v17 = vsel %vm702_vm4, %v670_v56, %v1596_v11  ;;  %v985_v3 = vsel %vm702_vm4, %v669_v55, %v1595_v12  ;;  %v1606_v18 = vunpack.i.h.bf16 %v1604_v13  ;;  %v1605_v19 = vunpack.i.l.bf16 %v1604_v13 }
 0x46d   : > { %v1599_v14 = vpop.permute.xlu1 %1598 }
 0x46e   : > { %v1601_v15 = vunpack.i.h.bf16 %v1599_v14  ;;  %v1600_v16 = vunpack.i.l.bf16 %v1599_v14 }
 0x470   : > { %v988_v6 = vsel %vm780_vm5, %v986_v17, %v1601_v15  ;;  %v987_v20 = vsel %vm780_vm5, %v985_v3, %v1600_v16 }
 0x471   : > { %v990_v21 = vsel %vm989_vm14, %v987_v20, %v1605_v19  ;;  %v991_v22 = vsel %vm989_vm14, %v988_v6, %v1606_v18 }
 0x472   : > { %v992_v23 = vpack.c.bf16 %v991_v22, %v990_v21 }
 0x474   : > { %1490 = vmatmul.mubr.bf16.vlgmr.msra.gmra.mxu1 %v992_v23 }
 0x4a0   : > { %v1129_v31 = vpop.trf.xlu1 }
 0x534   : > { %v1098_v24 = vpop.f32.mrf.mxu1 }
 0x535   : > { %v1099_v30 = vadd.f32 %v1374_v26, %v1098_v24 }
 0x536   : > { %v1491_v25 = vpop.f32.mrf.mxu1 }
 0x538   : > { %v1101_v27 = vpop.f32.mrf.mxu1 }
 0x539   : > { %v1102_v28 = vadd.f32 %v1374_v26, %v1101_v27 }
 0x53a   : > { %v1492_v29 = vpop.f32.mrf.mxu1 }
 0x53b   : > { %1494 = vmatpush3.msra.mxu0 %v1102_v28 }
 0x53c   : > { %1495 = vmatprep.subr.mxu0 %v1731_v49 }
 0x53d   : > { %1496 = vmatpush3.msra.mxu0 %v1099_v30 }
 0x53e   : > { %1498 = vmatmul.mubr.msk.f32.vlgmr.msra.gmra.mxu0 %vm1145_vm15, %v1129_v31 }
 0x5fe   : > { %v1215_v33 = vpop.f32.mrf.mxu0 }
 0x5ff   : > { %v1220_v34 = vadd.f32 %v1219_v32, %v1215_v33 }
 0x600   : > { %v1499_v35 = vpop.f32.mrf.mxu0 }
 0x601   : > { %1222 = vst.msk [vmem:[%s1882_s17] sm:$0xf] %vm1221_vm0, %v1220_v34 }
 0x602   : > { %1648 = shalt.err (!%p1645_p7)
}
 0x603   : > { %s1649_s17 = scalar_lea.hbm %s2070_s27, 64  ;;  %s1653_s14 = scalar_lea.hbm %s2130_s11, 128 }
 0x604   : > { %p1650_p8 = scmp.ne.s32.totalorder %s2070_s27, %s1649_s17  ;;  %p1654_p12 = scmp.lt.s32.totalorder %s2070_s27, %s2130_s11 }
 0x605   : > { %p1655_p13 = scmp.lt.s32.totalorder %s1653_s14, %s1649_s17 }
 0x606   : > { %p1651_p10 = pnand %p1650_p8, %p1847_p3 }
 0x607   : > { %p1656_p0 = por %p1655_p13, %p1654_p12 }
 0x608   : > { %p1652_p11 = pneg %p1651_p10 }
 0x60a   : > { %p1657_p1 = pnand %p1656_p0, %p1652_p11 }
 0x60c   : > { %1660 = shalt.err (!%p1657_p1)
}
 0x60d   : > { %1504 = dma.vmem_to_hbm [thread:$0]  (%p1847_p3), %s1238_s13, 64, %s2070_s27, %s1224_s23  }
 0x60e PF: > { %s2149_s16 = sld [smem:[#allocation6_spill]]  ;;  %p1510_p2 = scmp.ge.s32.totalorder %s1727_s24, 2 }
 0x610   : > { %p1507_p4 = pnand %p1510_p2, %p1857_p9 }
 0x612   : > { %p1508_p5 = pneg %p1507_p4 }
 0x614   : > { %s1249_s22 = sand.u32 1, %s2149_s16  }
 0x615   : > { %s1250_s28 = scalar_lea.sflag [#allocation4], %s1249_s22 }
 0x616   : > { %1694 = dma.done.wait (%p1508_p5), %s1250_s28, 64  }
 0x617   : > { %1696 = vsyncadd (%p1508_p5), %s1250_s28, 4294967232  ;;  %s24_s24 = sadd.s32 1, %s1727_s24   ;;  %s2151_s21 = sld [smem:[#allocation7_spill]] }
 0x618   : > { %p21_p6 = scmp.ge.s32.totalorder %s24_s24, 6   ;;  %s2152_s19 = sld [smem:[#allocation13_spill]] }
 0x619   : > { %s2153_s20 = sld [smem:[#allocation8_spill]]  ;;  %s2157_s17 = smov %s1703_s18 }
 0x61a   : > { %s2154_s29 = sld [smem:[#allocation9_spill]] }
 0x61b   : > { %s2155_s22 = sld [smem:[#allocation10_spill]] }
 0x61c   : > { %s2156_s23 = sld [smem:[#allocation11_spill]]  ;;  %23 = sbr.rel (!%p21_p6) target bundleno = 5 (0x5), region = 106 }
 0x61d   : > { %s2158_s18 = smov %s2151_s21 }
 0x620   : > { %s2159_s21 = smov %s2154_s29 }
 0x621   :  { %1255 = vsyncpa [#allocation4], 1 }
 0x622   :  { %1257 = vsyncpa [#allocation4 + $0x1], 1 }

</bundles_post_ra>
